<compile_context>
chip_gen: v7x
topology: tpu7x:2x2x1
jax: 0.10.0
libtpu: 0.0.40
codegen_flags: <defaults>
</compile_context>

<pallas_src>
import functools

import jax
import jax.numpy as jnp
from jax.experimental import pallas as pl
from jax.experimental.pallas import tpu as pltpu

_LANE = 128
_SUB = 8
_MAX_TILE_ROWS = 1024  # 1024 x 128 x f32 = 512 KiB per block per buffer.


def _round_up(a: int, b: int) -> int:
    return -(-a // b) * b


def _noise_kernel(x_ref, n_ref, o_ref, *, mean, std):
    """o = clamp(x + (n * std + mean), 0, 1); math in f32, store in o dtype."""
    x = x_ref[...].astype(jnp.float32)
    noisy = x + (n_ref[...] * std + mean)
    o_ref[...] = jnp.clip(noisy, 0.0, 1.0).astype(o_ref.dtype)


def _apply_noise(x, noise_key, *, mean, std):
    """Noisy branch: flatten -> Pallas elementwise kernel -> reshape back."""
    orig_shape = x.shape
    orig_dtype = x.dtype
    n = x.size

    # Lane-dense (rows, 128) slab; rows rounded to a multiple of 8, and of the
    # tile size when the slab spans several grid steps.
    rows = _round_up(max(_round_up(n, _LANE) // _LANE, 1), _SUB)
    if rows > _MAX_TILE_ROWS:
        rows = _round_up(rows, _MAX_TILE_ROWS)
        tile_rows = _MAX_TILE_ROWS
    else:
        tile_rows = rows
    pad = rows * _LANE - n

    x_flat = x.reshape(-1)
    if pad > 0:  # only pad when actually needed (usually a no-op for NCHW)
        x_flat = jnp.pad(x_flat, (0, pad))
    x_flat = x_flat.reshape(rows, _LANE)

    # Noise generated directly at the padded slab shape (f32); the padded tail
    # is sliced away afterwards, so the extra randoms are harmless.
    noise_flat = jax.random.normal(noise_key, (rows, _LANE), dtype=jnp.float32)

    kernel = functools.partial(_noise_kernel, mean=float(mean), std=float(std))

    out_flat = pl.pallas_call(
        kernel,
        out_shape=jax.ShapeDtypeStruct((rows, _LANE), orig_dtype),
        grid=(rows // tile_rows,),
        in_specs=[
            pl.BlockSpec((tile_rows, _LANE), lambda i: (i, 0)),
            pl.BlockSpec((tile_rows, _LANE), lambda i: (i, 0)),
        ],
        out_specs=pl.BlockSpec((tile_rows, _LANE), lambda i: (i, 0)),
        input_output_aliases={0: 0},  # reuse the flattened input's buffer
        compiler_params=pltpu.CompilerParams(
            dimension_semantics=("parallel",)
        ),
    )(x_flat, noise_flat)

    out = out_flat.reshape(-1)
    if pad > 0:
        out = out[:n]
    return out.reshape(orig_shape)


def add_gaussian_noise(x, key, *, mean=0.0, std=0.02, p=0.5):
    """Pallas implementation of AddGaussianNoise.forward.

    x:   float tensor (any shape, e.g. NCHW image batch) with values in [0,1].
    key: jax PRNG key — supplies both the Bernoulli(p) coin flip and the
         Gaussian noise.
    """
    if p <= 0.0:
        return x

    k_coin, k_noise = jax.random.split(key)
    noisy = functools.partial(_apply_noise, mean=mean, std=std)

    if p >= 1.0:
        return noisy(x, k_noise)

    apply = jax.random.uniform(k_coin, ()) < p
    return jax.lax.cond(apply, lambda t: noisy(t, k_noise), lambda t: t, x)


if __name__ == "__main__":
    key = jax.random.PRNGKey(0)
    k_x, k_apply, k_noapply, k_half = jax.random.split(key, 4)

    # Small NCHW image batch in [0, 1), consistent with a "tensor image".
    x = jax.random.uniform(k_x, (2, 4, 16, 16), dtype=jnp.float32)

    # p = 0.0 -> identity path (kernel skipped entirely).
    out_id = jax.block_until_ready(add_gaussian_noise(x, k_noapply, p=0.0))
    assert out_id.shape == x.shape and out_id.dtype == x.dtype
    assert bool(jnp.all(out_id == x)), "p=0 path must be identity"

    # p = 1.0 -> noise + clamp path (always runs the kernel).
    out_noisy = jax.block_until_ready(
        add_gaussian_noise(x, k_apply, mean=0.0, std=0.02, p=1.0))
    assert out_noisy.shape == x.shape and out_noisy.dtype == x.dtype
    assert bool(jnp.all(out_noisy >= 0.0)) and bool(jnp.all(out_noisy <= 1.0))
    max_diff = float(jnp.max(jnp.abs(out_noisy - x)))
    assert 0.0 < max_diff < 0.5, f"unexpected noise magnitude: {max_diff}"

    # p = 0.5 -> exercises the traced lax.cond gate around the kernel.
    out_half = jax.block_until_ready(add_gaussian_noise(x, k_half, p=0.5))
    assert out_half.shape == x.shape and out_half.dtype == x.dtype
    assert bool(jnp.all(out_half >= 0.0)) and bool(jnp.all(out_half <= 1.0))

    print("KERNEL_OK")
</pallas_src>

<mosaic_0001>
module attributes {stable_mosaic.version = 11 : i64} {
  func.func @_noise_kernel(%arg0: i32, %arg1: memref<16x128xf32, #tpu.memory_space<vmem>>, %arg2: memref<16x128xf32, #tpu.memory_space<vmem>>, %arg3: memref<16x128xf32, #tpu.memory_space<vmem>>) attributes {dimension_semantics = [#tpu.dimension_semantics<parallel>], iteration_bounds = array<i64: 1>, scalar_prefetch = 0 : i64, scratch_operands = 0 : i64, tpu.core_type = #tpu.core_type<tc>, window_params = [{transform_indices = @transform_0, window_bounds = array<i64: 16, 128>}, {transform_indices = @transform_1, window_bounds = array<i64: 16, 128>}, {transform_indices = @transform_2, window_bounds = array<i64: 16, 128>}]} {
    %c0 = arith.constant 0 : index
    %c0_0 = arith.constant 0 : index
    %0 = vector.load %arg1[%c0, %c0_0] : memref<16x128xf32, #tpu.memory_space<vmem>>, vector<16x128xf32>
    %c0_1 = arith.constant 0 : index
    %c0_2 = arith.constant 0 : index
    %1 = vector.load %arg2[%c0_1, %c0_2] : memref<16x128xf32, #tpu.memory_space<vmem>>, vector<16x128xf32>
    %cst = arith.constant 2.000000e-02 : f32
    %2 = vector.broadcast %cst : f32 to vector<16x128xf32>
    %3 = arith.mulf %1, %2 : vector<16x128xf32>
    %cst_3 = arith.constant 0.000000e+00 : f32
    %4 = vector.broadcast %cst_3 : f32 to vector<16x128xf32>
    %5 = arith.addf %3, %4 : vector<16x128xf32>
    %6 = arith.addf %0, %5 : vector<16x128xf32>
    %cst_4 = arith.constant 0.000000e+00 : f32
    %cst_5 = arith.constant 1.000000e+00 : f32
    %7 = vector.broadcast %cst_4 : f32 to vector<16x128xf32>
    %8 = arith.maximumf %7, %6 : vector<16x128xf32>
    %9 = vector.broadcast %cst_5 : f32 to vector<16x128xf32>
    %10 = arith.minimumf %9, %8 : vector<16x128xf32>
    %c0_6 = arith.constant 0 : index
    %c0_7 = arith.constant 0 : index
    %11 = vector.load %arg3[%c0_6, %c0_7] : memref<16x128xf32, #tpu.memory_space<vmem>>, vector<16x128xf32>
    tpu.vector_store %arg3[%c0_6, %c0_7], %10 {strides = array<i32>} : memref<16x128xf32, #tpu.memory_space<vmem>>, vector<16x128xf32>,
    return
  }
  func.func @transform_0(%arg0: i32) -> (i32, i32) {
    %c0_i32 = arith.constant 0 : i32
    %c0_i32_0 = arith.constant 0 : i32
    return %arg0, %c0_i32 : i32, i32
  }
  func.func @transform_1(%arg0: i32) -> (i32, i32) {
    %c0_i32 = arith.constant 0 : i32
    %c0_i32_0 = arith.constant 0 : i32
    return %arg0, %c0_i32 : i32, i32
  }
  func.func @transform_2(%arg0: i32) -> (i32, i32) {
    %c0_i32 = arith.constant 0 : i32
    %c0_i32_0 = arith.constant 0 : i32
    return %arg0, %c0_i32 : i32, i32
  }
}

</mosaic_0001>

<bundles_post_ra>
// kernel: tpu_custom_call.1
= control target key start
LH: loop header
LB: loop body
LE: loop exit
PB: predicated region body
PF: predicated region fallthrough
CT: control target
= control target key end

     0   :  { %7 = vsyncpa [#allocation3], 0  ;;  %s166_s0 = inlined_call_operand.hbm [shape: f32[16,128], index: 0, kind: input, shape index: {}, may-alias: {0,2}]   ;;  %s167_s1 = inlined_call_operand.vmem [shape: f32[16,128], index: 1, kind: input, shape index: {}]   ;;  %s168_s2 = inlined_call_operand.hbm [shape: f32[16,128], index: 2, kind: output, shape index: {}, may-alias: {0,2}]  }
   0x1   :  { %8 = vsyncpa [#allocation4], 0  ;;  %s111_s9 = smov [#allocation2]   ;;  %s63_s13 = scalar_lea.hbm %s166_s0, 256 }
   0x2   :  { %s14_s10 = sshll.u32 %s111_s9, 4  ;;  %p64_p0 = scmp.ne.s32.totalorder %s166_s0, %s63_s13  ;;  %s15_s10 = int_to_ptr.vmem [resolvable:$true] %s14_s10 }
   0x3   :  { %p67_p1 = scmp.lt.u32.totalorder %s63_s13, %s166_s0 }
   0x5   :  { %p69_p2 = pnand %p67_p1, %p64_p0 }
   0x7   :  { %72 = shalt.err (!%p69_p2)
}
   0x8   :  { %s73_s18 = scalar_lea.vmem %s15_s10, 256  ;;  %p78_p4 = scmp.lt.s32.totalorder %s15_s10, %s15_s10 }
   0x9   :  { %p74_p3 = scmp.ne.s32.totalorder %s15_s10, %s73_s18  ;;  %p79_p5 = scmp.lt.s32.totalorder %s73_s18, %s73_s18 }
   0xb   :  { %p80_p6 = por %p79_p5, %p78_p4 }
   0xd   :  { %p81_p7 = pnand %p80_p6, %p74_p3 }
   0xf   :  { %84 = shalt.err (!%p81_p7)
}
  0x10   :  { %s112_s19 = smov 128   ;;  %s113_s20 = smov 8  }
  0x11   :  { %20 = dma.hbm_to_vmem [thread:$0]  %s166_s0, 256, %s15_s10, [#allocation3], %s112_s19, %s112_s19, %s113_s20  }
  0x12   :  { %107 = dma.done.wait [#allocation3], 256  }
  0x13   :  { %108 = vsyncadd [#allocation3], 4294967040  ;;  %v26_v0 = vld [vmem:[#allocation2] sm:$0xff]  ;;  %v27_v3 = vld [vmem:[#allocation2 + $0x8] sm:$0xff]  ;;  %s114_s27 = smov [#allocation5]  }
  0x14   :  { %v28_v1 = vld [vmem:[%s167_s1] sm:$0xff]  ;;  %v29_v4 = vld [vmem:[%s167_s1 + $0x8] sm:$0xff]  ;;  %s47_s28 = sshll.u32 %s114_s27, 4  ;;  %s48_s28 = int_to_ptr.vmem [resolvable:$true] %s47_s28 }
  0x15   :  { %v30_v2 = vmul.f32 0.02, %v28_v1  ;;  %v31_v5 = vmul.f32 0.02, %v29_v4  ;;  %s85_s0 = scalar_lea.vmem %s48_s28, 256  ;;  %p90_p9 = scmp.lt.s32.totalorder %s48_s28, %s48_s28 }
  0x16   :  { %p86_p8 = scmp.ne.s32.totalorder %s48_s28, %s85_s0  ;;  %p91_p10 = scmp.lt.s32.totalorder %s85_s0, %s85_s0 }
  0x17   :  { %v34_v6 = vadd.f32 %v30_v2, %v26_v0  ;;  %v35_v7 = vadd.f32 %v31_v5, %v27_v3 }
  0x18   :  { %p92_p11 = por %p91_p10, %p90_p9 }
  0x19   :  { %v36_v8 = vmax.f32 %v34_v6, 0.0  ;;  %v37_v9 = vmax.f32 %v35_v7, 0.0 }
  0x1a   :  { %p93_p12 = pnand %p92_p11, %p86_p8 }
  0x1b   :  { %v38_v10 = vmin.f32 %v36_v8, 1.0  ;;  %v39_v11 = vmin.f32 %v37_v9, 1.0 }
  0x1d   :  { %40 = vst [vmem:[#allocation5] sm:$0xff] %v38_v10  ;;  %41 = vst [vmem:[#allocation5 + $0x8] sm:$0xff] %v39_v11 }
  0x1e   :  { %96 = shalt.err (!%p93_p12)
}
  0x1f   :  { %s97_s30 = scalar_lea.hbm %s168_s2, 256 }
  0x20   :  { %p98_p13 = scmp.ne.s32.totalorder %s168_s2, %s97_s30  ;;  %p101_p0 = scmp.lt.u32.totalorder %s97_s30, %s168_s2 }
  0x22   :  { %p103_p1 = pnand %p101_p0, %p98_p13 }
  0x24   :  { %106 = shalt.err (!%p103_p1)
}
  0x25   :  { %53 = dma.vmem_to_hbm [thread:$0]  %s48_s28, 256, %s168_s2, [#allocation4], %s112_s19, %s112_s19, %s113_s20  }
  0x26   :  { %109 = dma.done.wait [#allocation4], 256  }
  0x27   :  { %110 = vsyncadd [#allocation4], 4294967040 }
  0x28   :  { %57 = vsyncpa [#allocation3], 1 }
  0x29   :  { %58 = vsyncpa [#allocation4], 1 }

</bundles_post_ra>
